<compile_context>
chip_gen: v6e
topology: v6e:2x2x1
jax: 0.10.0
libtpu: 0.0.40
codegen_flags: <defaults>
</compile_context>

<pallas_src>
import jax
import jax.numpy as jnp
from jax.experimental import pallas as pl
from jax.experimental.pallas import tpu as pltpu


# ----------------------------------------------------------------------------
# Table construction (plain-JAX glue, mirrors RotaryEmbedding.make_rotary_embedding)
# ----------------------------------------------------------------------------

def make_rotary_tables(seq_len, dim, scale_base=512):
    """Raw (freqs, scale) tables, identical to the PyTorch module."""
    inv_freq = 1.0 / (10000.0 ** (jnp.arange(0, dim, 2, dtype=jnp.float32) / dim))
    scale_vec = (jnp.arange(0, dim, 2, dtype=jnp.float32) + 0.4 * dim) / (1.4 * dim)

    t = jnp.arange(seq_len, dtype=jnp.float32)
    freqs = t[:, None] * inv_freq[None, :]                 # (S, D/2)
    freqs = jnp.concatenate((freqs, freqs), axis=-1)       # (S, D)

    power = (t - seq_len // 2) / scale_base                # (S,)
    scale = scale_vec[None, :] ** power[:, None]           # (S, D/2)
    scale = jnp.concatenate((scale, scale), axis=-1)       # (S, D)
    return freqs, scale


def make_fused_rope_tables(seq_len, dim, scale_base=512):
    """Fold cos/sin, the rotate_half sign, and the xpos scale into 4 f32 tables.

    rotate_half(x) == half_swap(x) * sign with sign = [-1]*(D/2) + [+1]*(D/2):

      q_out = q * (cos*scale) + half_swap(q) * (sign*sin*scale)
      k_out = k * (cos/scale) + half_swap(k) * (sign*sin/scale)
    """
    freqs, scale = make_rotary_tables(seq_len, dim, scale_base)
    cos = jnp.cos(freqs)
    sin = jnp.sin(freqs)
    half = dim // 2
    sign = jnp.concatenate(
        (-jnp.ones((1, half), jnp.float32), jnp.ones((1, half), jnp.float32)),
        axis=-1)                                           # (1, D)

    cos_q = cos * scale
    sin_q = sin * sign * scale
    cos_k = cos / scale
    sin_k = sin * sign / scale
    return cos_q, sin_q, cos_k, sin_k


# ----------------------------------------------------------------------------
# Pallas kernel
# ----------------------------------------------------------------------------

def rope_kernel(q_ref, k_ref, cq_ref, sq_ref, ck_ref, sk_ref, qo_ref, ko_ref):
    d = q_ref.shape[-1]
    half = d // 2
    q = q_ref[...]                                   # (tb, ts, D), input dtype
    k = k_ref[...]

    # rotate_half: the sign lives in the sin tables, so only the half-swap
    # [x2, x1] is needed here (static lane slices; kernel is HBM-bound so the
    # extra lane shuffle is free).
    q_rot = jnp.concatenate((q[..., half:], q[..., :half]), axis=-1)
    k_rot = jnp.concatenate((k[..., half:], k[..., :half]), axis=-1)

    # Tables are (ts, D) f32 and broadcast over the batch tile; compute in f32
    # (via promotion) and cast back at the store.
    qo_ref[...] = (q * cq_ref[...] + q_rot * sq_ref[...]).astype(qo_ref.dtype)
    ko_ref[...] = (k * ck_ref[...] + k_rot * sk_ref[...]).astype(ko_ref.dtype)


# ----------------------------------------------------------------------------
# Tiling / wrapper
# ----------------------------------------------------------------------------

def _pick_tiles(B, S, D, itemsize, target_block_bytes=1 << 20):
    """Pick (batch_tile, seq_tile) so each q/k block is ~512KiB-1MiB."""
    ts = None
    for cand in (1024, 512, 256, 128, 64, 32, 16, 8):
        if cand <= S and S % cand == 0:
            ts = cand
            break
    if ts is None:
        # No power-of-two divisor (tiny or awkward S): cap the tile and let a
        # ragged pl.cdiv grid mask the last block instead of blowing VMEM
        # (the old full-sequence fallback could exceed v7x's 64 MiB VMEM).
        ts = S if S <= 512 else 512

    row_bytes = ts * D * itemsize
    tb = 1
    for cand in range(B, 0, -1):
        if B % cand == 0 and cand * row_bytes <= target_block_bytes:
            tb = cand
            break
    return tb, ts


def rotary_embedding_forward(q, k, scale_base=512, *, seq_tile=None,
                             batch_tile=None, donate_inputs=False):
    B, S, D = q.shape
    assert k.shape == q.shape and k.dtype == q.dtype
    assert D % 2 == 0, "rotary dim must be even"

    # Tables stay f32 regardless of q/k dtype (accuracy); after the table
    # dedup their bandwidth is negligible (read once per seq tile).
    cos_q, sin_q, cos_k, sin_k = make_fused_rope_tables(S, D, scale_base)

    itemsize = q.dtype.itemsize
    tb, ts = _pick_tiles(B, S, D, itemsize)
    if seq_tile is not None:
        ts = seq_tile
    if batch_tile is not None:
        tb = batch_tile
    n_s = pl.cdiv(S, ts)
    n_b = pl.cdiv(B, tb)

    # Grid order (seq outer, batch inner): the table block index depends only
    # on the outer axis, so Pallas DMAs each table tile once per seq tile
    # (total 4*S*D bytes) instead of once per grid step.
    qk_spec = pl.BlockSpec((tb, ts, D), lambda s, b: (b, s, 0))
    tbl_spec = pl.BlockSpec((ts, D), lambda s, b: (s, 0))

    cost = pl.CostEstimate(
        flops=6 * B * S * D,                         # 2 mul + 1 add per output elem
        transcendentals=0,
        bytes_accessed=4 * B * S * D * itemsize + 4 * S * D * 4,
    )

    extra_kwargs = {}
    if donate_inputs:
        # q -> q_out, k -> k_out (only if the caller no longer needs raw q/k).
        extra_kwargs["input_output_aliases"] = {0: 0, 1: 1}

    q_out, k_out = pl.pallas_call(
        rope_kernel,
        out_shape=(
            jax.ShapeDtypeStruct(q.shape, q.dtype),
            jax.ShapeDtypeStruct(k.shape, k.dtype),
        ),
        grid=(n_s, n_b),
        in_specs=[qk_spec, qk_spec, tbl_spec, tbl_spec, tbl_spec, tbl_spec],
        out_specs=(qk_spec, qk_spec),
        compiler_params=pltpu.CompilerParams(
            dimension_semantics=("parallel", "parallel"),
            vmem_limit_bytes=32 * 1024 * 1024),
        cost_estimate=cost,
        **extra_kwargs,
    )(q, k, cos_q, sin_q, cos_k, sin_k)
    return q_out, k_out


# ----------------------------------------------------------------------------
# Pure-JAX reference (mirrors the PyTorch forward exactly)
# ----------------------------------------------------------------------------

def _rotate_half(x):
    d = x.shape[-1]
    x1 = x[..., : d // 2]
    x2 = x[..., d // 2:]
    return jnp.concatenate((-x2, x1), axis=-1)


def rotary_embedding_reference(q, k, scale_base=512):
    _, S, D = q.shape
    pos, scale = make_rotary_tables(S, D, scale_base)
    cos, sin = jnp.cos(pos), jnp.sin(pos)
    q_out = (q * cos + _rotate_half(q) * sin) * scale
    k_out = (k * cos + _rotate_half(k) * sin) / scale
    return q_out, k_out


# TODO(synk): the PyTorch module's persistent-buffer caching in
# get_rotary_embedding is host-side Python state; tables are rebuilt per call
# here (cache them at the caller or under jit if desired).

if __name__ == "__main__":
    key = jax.random.PRNGKey(0)
    kq, kk = jax.random.split(key)
    # D = 128 keeps the lane dimension dense; S = 128, B = 2 stays small.
    B, S, D = 2, 128, 128
    q = jax.random.normal(kq, (B, S, D), dtype=jnp.float32)
    k = jax.random.normal(kk, (B, S, D), dtype=jnp.float32)

    q_out, k_out = rotary_embedding_forward(q, k)
    jax.block_until_ready((q_out, k_out))

    q_ref, k_ref = rotary_embedding_reference(q, k)
    assert jnp.allclose(q_out, q_ref, atol=1e-4, rtol=1e-4), "q mismatch"
    assert jnp.allclose(k_out, k_ref, atol=1e-4, rtol=1e-4), "k mismatch"

    print("KERNEL_OK")
</pallas_src>

<mosaic_0001>
module attributes {stable_mosaic.version = 11 : i64} {
  func.func @rope_kernel(%arg0: i32, %arg1: i32, %arg2: memref<2x128x128xf32, #tpu.memory_space<vmem>>, %arg3: memref<2x128x128xf32, #tpu.memory_space<vmem>>, %arg4: memref<128x128xf32, #tpu.memory_space<vmem>>, %arg5: memref<128x128xf32, #tpu.memory_space<vmem>>, %arg6: memref<128x128xf32, #tpu.memory_space<vmem>>, %arg7: memref<128x128xf32, #tpu.memory_space<vmem>>, %arg8: memref<2x128x128xf32, #tpu.memory_space<vmem>>, %arg9: memref<2x128x128xf32, #tpu.memory_space<vmem>>) attributes {dimension_semantics = [#tpu.dimension_semantics<parallel>, #tpu.dimension_semantics<parallel>], iteration_bounds = array<i64: 1, 1>, scalar_prefetch = 0 : i64, scratch_operands = 0 : i64, tpu.core_type = #tpu.core_type<tc>, window_params = [{transform_indices = @transform_0, window_bounds = array<i64: 2, 128, 128>}, {transform_indices = @transform_1, window_bounds = array<i64: 2, 128, 128>}, {transform_indices = @transform_2, window_bounds = array<i64: 128, 128>}, {transform_indices = @transform_3, window_bounds = array<i64: 128, 128>}, {transform_indices = @transform_4, window_bounds = array<i64: 128, 128>}, {transform_indices = @transform_5, window_bounds = array<i64: 128, 128>}, {transform_indices = @transform_6, window_bounds = array<i64: 2, 128, 128>}, {transform_indices = @transform_7, window_bounds = array<i64: 2, 128, 128>}]} {
    %c0 = arith.constant 0 : index
    %c0_0 = arith.constant 0 : index
    %c0_1 = arith.constant 0 : index
    %0 = vector.load %arg2[%c0, %c0_0, %c0_1] : memref<2x128x128xf32, #tpu.memory_space<vmem>>, vector<2x128x128xf32>
    %c0_2 = arith.constant 0 : index
    %c0_3 = arith.constant 0 : index
    %c0_4 = arith.constant 0 : index
    %1 = vector.load %arg3[%c0_2, %c0_3, %c0_4] : memref<2x128x128xf32, #tpu.memory_space<vmem>>, vector<2x128x128xf32>
    %2 = vector.extract_strided_slice %0 {offsets = [0, 0, 64], sizes = [2, 128, 64], strides = [1, 1, 1]} : vector<2x128x128xf32> to vector<2x128x64xf32>
    %3 = vector.extract_strided_slice %0 {offsets = [0, 0, 0], sizes = [2, 128, 64], strides = [1, 1, 1]} : vector<2x128x128xf32> to vector<2x128x64xf32>
    %4 = tpu.concatenate %2, %3 in 2 : vector<2x128x64xf32>, vector<2x128x64xf32> -> vector<2x128x128xf32>
    %5 = vector.extract_strided_slice %1 {offsets = [0, 0, 64], sizes = [2, 128, 64], strides = [1, 1, 1]} : vector<2x128x128xf32> to vector<2x128x64xf32>
    %6 = vector.extract_strided_slice %1 {offsets = [0, 0, 0], sizes = [2, 128, 64], strides = [1, 1, 1]} : vector<2x128x128xf32> to vector<2x128x64xf32>
    %7 = tpu.concatenate %5, %6 in 2 : vector<2x128x64xf32>, vector<2x128x64xf32> -> vector<2x128x128xf32>
    %c0_5 = arith.constant 0 : index
    %c0_6 = arith.constant 0 : index
    %8 = vector.load %arg4[%c0_5, %c0_6] : memref<128x128xf32, #tpu.memory_space<vmem>>, vector<128x128xf32>
    %9 = vector.shape_cast %8 : vector<128x128xf32> to vector<1x128x128xf32>
    %10 = vector.broadcast %9 : vector<1x128x128xf32> to vector<2x128x128xf32>
    %11 = arith.mulf %0, %10 : vector<2x128x128xf32>
    %c0_7 = arith.constant 0 : index
    %c0_8 = arith.constant 0 : index
    %12 = vector.load %arg5[%c0_7, %c0_8] : memref<128x128xf32, #tpu.memory_space<vmem>>, vector<128x128xf32>
    %13 = vector.shape_cast %12 : vector<128x128xf32> to vector<1x128x128xf32>
    %14 = vector.broadcast %13 : vector<1x128x128xf32> to vector<2x128x128xf32>
    %15 = arith.mulf %4, %14 : vector<2x128x128xf32>
    %16 = arith.addf %11, %15 : vector<2x128x128xf32>
    %c0_9 = arith.constant 0 : index
    %c0_10 = arith.constant 0 : index
    %c0_11 = arith.constant 0 : index
    %17 = vector.load %arg8[%c0_9, %c0_10, %c0_11] : memref<2x128x128xf32, #tpu.memory_space<vmem>>, vector<2x128x128xf32>
    tpu.vector_store %arg8[%c0_9, %c0_10, %c0_11], %16 {strides = array<i32>} : memref<2x128x128xf32, #tpu.memory_space<vmem>>, vector<2x128x128xf32>,
    %c0_12 = arith.constant 0 : index
    %c0_13 = arith.constant 0 : index
    %18 = vector.load %arg6[%c0_12, %c0_13] : memref<128x128xf32, #tpu.memory_space<vmem>>, vector<128x128xf32>
    %19 = vector.shape_cast %18 : vector<128x128xf32> to vector<1x128x128xf32>
    %20 = vector.broadcast %19 : vector<1x128x128xf32> to vector<2x128x128xf32>
    %21 = arith.mulf %1, %20 : vector<2x128x128xf32>
    %c0_14 = arith.constant 0 : index
    %c0_15 = arith.constant 0 : index
    %22 = vector.load %arg7[%c0_14, %c0_15] : memref<128x128xf32, #tpu.memory_space<vmem>>, vector<128x128xf32>
    %23 = vector.shape_cast %22 : vector<128x128xf32> to vector<1x128x128xf32>
    %24 = vector.broadcast %23 : vector<1x128x128xf32> to vector<2x128x128xf32>
    %25 = arith.mulf %7, %24 : vector<2x128x128xf32>
    %26 = arith.addf %21, %25 : vector<2x128x128xf32>
    %c0_16 = arith.constant 0 : index
    %c0_17 = arith.constant 0 : index
    %c0_18 = arith.constant 0 : index
    %27 = vector.load %arg9[%c0_16, %c0_17, %c0_18] : memref<2x128x128xf32, #tpu.memory_space<vmem>>, vector<2x128x128xf32>
    tpu.vector_store %arg9[%c0_16, %c0_17, %c0_18], %26 {strides = array<i32>} : memref<2x128x128xf32, #tpu.memory_space<vmem>>, vector<2x128x128xf32>,
    return
  }
  func.func @transform_0(%arg0: i32, %arg1: i32) -> (i32, i32, i32) {
    %c0_i32 = arith.constant 0 : i32
    %c0_i32_0 = arith.constant 0 : i32
    return %arg1, %arg0, %c0_i32 : i32, i32, i32
  }
  func.func @transform_1(%arg0: i32, %arg1: i32) -> (i32, i32, i32) {
    %c0_i32 = arith.constant 0 : i32
    %c0_i32_0 = arith.constant 0 : i32
    return %arg1, %arg0, %c0_i32 : i32, i32, i32
  }
  func.func @transform_2(%arg0: i32, %arg1: i32) -> (i32, i32) {
    %c0_i32 = arith.constant 0 : i32
    %c0_i32_0 = arith.constant 0 : i32
    return %arg0, %c0_i32 : i32, i32
  }
  func.func @transform_3(%arg0: i32, %arg1: i32) -> (i32, i32) {
    %c0_i32 = arith.constant 0 : i32
    %c0_i32_0 = arith.constant 0 : i32
    return %arg0, %c0_i32 : i32, i32
  }
  func.func @transform_4(%arg0: i32, %arg1: i32) -> (i32, i32) {
    %c0_i32 = arith.constant 0 : i32
    %c0_i32_0 = arith.constant 0 : i32
    return %arg0, %c0_i32 : i32, i32
  }
  func.func @transform_5(%arg0: i32, %arg1: i32) -> (i32, i32) {
    %c0_i32 = arith.constant 0 : i32
    %c0_i32_0 = arith.constant 0 : i32
    return %arg0, %c0_i32 : i32, i32
  }
  func.func @transform_6(%arg0: i32, %arg1: i32) -> (i32, i32, i32) {
    %c0_i32 = arith.constant 0 : i32
    %c0_i32_0 = arith.constant 0 : i32
    return %arg1, %arg0, %c0_i32 : i32, i32, i32
  }
  func.func @transform_7(%arg0: i32, %arg1: i32) -> (i32, i32, i32) {
    %c0_i32 = arith.constant 0 : i32
    %c0_i32_0 = arith.constant 0 : i32
    return %arg1, %arg0, %c0_i32 : i32, i32, i32
  }
}

</mosaic_0001>

<bundles_post_ra>
// kernel: tpu_custom_call.1
= control target key start
LH: loop header
LB: loop body
LE: loop exit
PB: predicated region body
PF: predicated region fallthrough
CT: control target
= control target key end

     0   :  { %13 = vsyncpa [#allocation3], 0  ;;  %s1643_s0 = inlined_call_operand.hbm [shape: f32[2,128,128], index: 0, kind: input, shape index: {}]   ;;  %s1644_s1 = inlined_call_operand.hbm [shape: f32[2,128,128], index: 1, kind: input, shape index: {}]   ;;  %s1645_s2 = inlined_call_operand.hbm [shape: f32[128,128], index: 2, kind: input, shape index: {}]   ;;  %s1646_s3 = inlined_call_operand.hbm [shape: f32[128,128], index: 3, kind: input, shape index: {}]   ;;  %s1647_s4 = inlined_call_operand.hbm [shape: f32[128,128], index: 4, kind: input, shape index: {}]   ;;  %s1648_s5 = inlined_call_operand.hbm [shape: f32[128,128], index: 5, kind: input, shape index: {}]   ;;  %s1649_s6 = inlined_call_operand.hbm [shape: f32[2,128,128], index: 6, kind: output, shape index: {0}]   ;;  %s1650_s7 = inlined_call_operand.hbm [shape: f32[2,128,128], index: 7, kind: output, shape index: {1}]  }
   0x1   :  { %14 = vsyncpa [#allocation6], 0 }
   0x2   :  { %15 = vsyncpa [#allocation9], 0 }
   0x3   :  { %16 = vsyncpa [#allocation12], 0 }
   0x4   :  { %17 = vsyncpa [#allocation4], 0 }
   0x5   :  { %18 = vsyncpa [#allocation15], 0  ;;  %s968_s24 = smov [#allocation5]   ;;  %s969_s26 = smov [#allocation8]  }
   0x6   :  { %s36_s25 = sshll.u32 %s968_s24, 4  ;;  %s60_s27 = sshll.u32 %s969_s26, 4  ;;  %s37_s25 = int_to_ptr.vmem [resolvable:$true] %s36_s25  ;;  %s61_s27 = int_to_ptr.vmem [resolvable:$true] %s60_s27 }
   0x7   :  { %s804_s28 = scalar_lea.vmem %s37_s25, 4096  ;;  %p809_p1 = scmp.lt.s32.totalorder %s37_s25, %s37_s25 }
   0x8   :  { %p805_p0 = scmp.ne.s32.totalorder %s37_s25, %s804_s28  ;;  %p810_p2 = scmp.lt.s32.totalorder %s804_s28, %s804_s28 }
   0xa   :  { %p811_p3 = por %p810_p2, %p809_p1 }
   0xc   :  { %p812_p4 = pnand %p811_p3, %p805_p0 }
   0xe   :  { %815 = shalt.err (!%p812_p4)
}
   0xf   :  { %s970_s29 = smov 128   ;;  %s971_s30 = smov 8  }
  0x10   :  { %42 = dma.hbm_to_vmem [thread:$0]  %s1644_s1, 4096, %s37_s25, [#allocation6], %s970_s29, %s970_s29, %s971_s30  }
  0x11   :  { %s824_s10 = scalar_lea.vmem %s61_s27, 2048  ;;  %p829_p6 = scmp.lt.s32.totalorder %s61_s27, %s61_s27 }
  0x12   :  { %p825_p5 = scmp.ne.s32.totalorder %s61_s27, %s824_s10  ;;  %p830_p7 = scmp.lt.s32.totalorder %s824_s10, %s824_s10 }
  0x14   :  { %p831_p8 = por %p830_p7, %p829_p6 }
  0x16   :  { %p832_p9 = pnand %p831_p8, %p825_p5 }
  0x18   :  { %835 = shalt.err (!%p832_p9)
}
  0x19   :  { %66 = dma.hbm_to_vmem [thread:$0]  %s1646_s3, 2048, %s61_s27, [#allocation9], %s970_s29, %s970_s29, %s971_s30  }
  0x1a   :  { %s972_s13 = smov [#allocation2]   ;;  %s973_s15 = smov [#allocation7]  }
  0x1b   :  { %s24_s14 = sshll.u32 %s972_s13, 4  ;;  %s48_s16 = sshll.u32 %s973_s15, 4  ;;  %s25_s14 = int_to_ptr.vmem [resolvable:$true] %s24_s14  ;;  %s49_s16 = int_to_ptr.vmem [resolvable:$true] %s48_s16 }
  0x1c   :  { %s844_s1 = scalar_lea.vmem %s25_s14, 4096  ;;  %p849_p11 = scmp.lt.s32.totalorder %s25_s14, %s25_s14 }
  0x1d   :  { %p845_p10 = scmp.ne.s32.totalorder %s25_s14, %s844_s1  ;;  %p850_p12 = scmp.lt.s32.totalorder %s844_s1, %s844_s1 }
  0x1f   :  { %p851_p13 = por %p850_p12, %p849_p11 }
  0x21   :  { %p852_p0 = pnand %p851_p13, %p845_p10 }
  0x23   :  { %855 = shalt.err (!%p852_p0)
}
  0x24   :  { %30 = dma.hbm_to_vmem [thread:$0]  %s1643_s0, 4096, %s25_s14, [#allocation3], %s970_s29, %s970_s29, %s971_s30  }
  0x25   :  { %s864_s3 = scalar_lea.vmem %s49_s16, 2048  ;;  %p869_p2 = scmp.lt.s32.totalorder %s49_s16, %s49_s16 }
  0x26   :  { %p865_p1 = scmp.ne.s32.totalorder %s49_s16, %s864_s3  ;;  %p870_p3 = scmp.lt.s32.totalorder %s864_s3, %s864_s3 }
  0x28   :  { %p871_p4 = por %p870_p3, %p869_p2 }
  0x2a   :  { %p872_p5 = pnand %p871_p4, %p865_p1 }
  0x2c   :  { %875 = shalt.err (!%p872_p5)
}
  0x2d   :  { %54 = dma.hbm_to_vmem [thread:$0]  %s1645_s2, 2048, %s49_s16, [#allocation6], %s970_s29, %s970_s29, %s971_s30  }
  0x2e   :  { %s974_s21 = smov [#allocation10]   ;;  %s975_s23 = smov [#allocation11]  }
  0x2f   :  { %s72_s22 = sshll.u32 %s974_s21, 4  ;;  %s84_s24 = sshll.u32 %s975_s23, 4  ;;  %s73_s22 = int_to_ptr.vmem [resolvable:$true] %s72_s22  ;;  %s85_s24 = int_to_ptr.vmem [resolvable:$true] %s84_s24 }
  0x30   :  { %s884_s0 = scalar_lea.vmem %s73_s22, 2048  ;;  %p889_p7 = scmp.lt.s32.totalorder %s73_s22, %s73_s22 }
  0x31   :  { %p885_p6 = scmp.ne.s32.totalorder %s73_s22, %s884_s0  ;;  %p890_p8 = scmp.lt.s32.totalorder %s884_s0, %s884_s0 }
  0x33   :  { %p891_p9 = por %p890_p8, %p889_p7 }
  0x35   :  { %p892_p10 = pnand %p891_p9, %p885_p6 }
  0x37   :  { %895 = shalt.err (!%p892_p10)
}
  0x38   :  { %78 = dma.hbm_to_vmem [thread:$0]  %s1647_s4, 2048, %s73_s22, [#allocation9], %s970_s29, %s970_s29, %s971_s30  }
  0x39   :  { %s904_s2 = scalar_lea.vmem %s85_s24, 2048  ;;  %p909_p12 = scmp.lt.s32.totalorder %s85_s24, %s85_s24 }
  0x3a   :  { %p905_p11 = scmp.ne.s32.totalorder %s85_s24, %s904_s2  ;;  %p910_p13 = scmp.lt.s32.totalorder %s904_s2, %s904_s2 }
  0x3c   :  { %p911_p0 = por %p910_p13, %p909_p12 }
  0x3e   :  { %p912_p1 = pnand %p911_p0, %p905_p11 }
  0x40   :  { %915 = shalt.err (!%p912_p1)
}
  0x41   :  { %90 = dma.hbm_to_vmem [thread:$0]  %s1648_s5, 2048, %s85_s24, [#allocation12], %s970_s29, %s970_s29, %s971_s30  }
  0x42   :  { %956 = dma.done.wait [#allocation3], 4096  }
  0x43   :  { %957 = vsyncadd [#allocation3], 4294963200 }
  0x44   :  { %958 = dma.done.wait [#allocation6], 6144  }
  0x45   :  { %959 = vsyncadd [#allocation6], 4294961152 }
  0x46   :  { %960 = dma.done.wait [#allocation9], 4096  }
  0x47   :  { %961 = vsyncadd [#allocation9], 4294963200 }
  0x48   :  { %962 = dma.done.wait [#allocation12], 2048  }
  0x49   :  { %963 = vsyncadd [#allocation12], 4294965248  ;;  %v1055_v0 = vld [vmem:[#allocation2 + $0x10] sm:$0xff]  ;;  %v1057_v1 = vld [vmem:[#allocation2] sm:$0xff]  ;;  %s976_s4 = smov 64   ;;  %s977_s5 = smov [#allocation13]  }
  0x4a   :  { %209 = vrot.lane.b32.xlu1 %v1055_v0, %s976_s4  ;;  %205 = vrot.lane.b32.xlu0 %v1057_v1, %s976_s4  ;;  %v1063_v2 = vld [vmem:[#allocation2 + $0x18] sm:$0xff]  ;;  %v1065_v3 = vld [vmem:[#allocation2 + $0x8] sm:$0xff]  ;;  %v1073_v5 = vld [vmem:[#allocation2 + $0x20] sm:$0xff]  ;;  %s754_s8 = sshll.u32 %s977_s5, 4  ;;  %s755_s8 = int_to_ptr.vmem [resolvable:$true] %s754_s8 }
  0x4b   :  { %v1071_v4 = vld [vmem:[#allocation2 + $0x28] sm:$0xff]  ;;  %v1079_v6 = vld [vmem:[#allocation2 + $0x38] sm:$0xff]  ;;  %v1081_v7 = vld [vmem:[#allocation2 + $0x30] sm:$0xff]  ;;  %s916_s9 = scalar_lea.vmem %s755_s8, 4096  ;;  %p921_p3 = scmp.lt.s32.totalorder %s755_s8, %s755_s8 }
  0x4c   :  { %v1087_v8 = vld [vmem:[#allocation2 + $0x48] sm:$0xff]  ;;  %v1089_v9 = vld [vmem:[#allocation2 + $0x40] sm:$0xff]  ;;  %v1095_v10 = vld [vmem:[#allocation2 + $0x58] sm:$0xff]  ;;  %p917_p2 = scmp.ne.s32.totalorder %s755_s8, %s916_s9  ;;  %p922_p4 = scmp.lt.s32.totalorder %s916_s9, %s916_s9 }
  0x4d   :  { %v1097_v11 = vld [vmem:[#allocation2 + $0x50] sm:$0xff]  ;;  %v1103_v12 = vld [vmem:[#allocation2 + $0x68] sm:$0xff]  ;;  %v1105_v13 = vld [vmem:[#allocation2 + $0x60] sm:$0xff] }
  0x4e   :  { %211 = vrot.lane.b32.xlu1 %v1063_v2, %s976_s4  ;;  %207 = vrot.lane.b32.xlu0 %v1065_v3, %s976_s4  ;;  %v1111_v14 = vld [vmem:[#allocation2 + $0x78] sm:$0xff]  ;;  %v1113_v15 = vld [vmem:[#allocation2 + $0x70] sm:$0xff]  ;;  %v1119_v16 = vld [vmem:[#allocation2 + $0x88] sm:$0xff]  ;;  %p923_p5 = por %p922_p4, %p921_p3 }
  0x4f   :  { %v1121_v17 = vld [vmem:[#allocation2 + $0x80] sm:$0xff]  ;;  %v1127_v18 = vld [vmem:[#allocation2 + $0x98] sm:$0xff]  ;;  %v1129_v19 = vld [vmem:[#allocation2 + $0x90] sm:$0xff] }
  0x50   :  { %v1135_v20 = vld [vmem:[#allocation2 + $0xa8] sm:$0xff]  ;;  %v1137_v21 = vld [vmem:[#allocation2 + $0xa0] sm:$0xff]  ;;  %v1143_v22 = vld [vmem:[#allocation2 + $0xb8] sm:$0xff]  ;;  %p924_p6 = pnand %p923_p5, %p917_p2 }
  0x51   :  { %v1145_v23 = vld [vmem:[#allocation2 + $0xb0] sm:$0xff]  ;;  %v1151_v24 = vld [vmem:[#allocation2 + $0xc8] sm:$0xff]  ;;  %v1153_v25 = vld [vmem:[#allocation2 + $0xc0] sm:$0xff] }
  0x52   :  { %215 = vrot.lane.b32.xlu1 %v1071_v4, %s976_s4  ;;  %213 = vrot.lane.b32.xlu0 %v1073_v5, %s976_s4  ;;  %v1159_v26 = vld [vmem:[#allocation2 + $0xd8] sm:$0xff]  ;;  %v1161_v27 = vld [vmem:[#allocation2 + $0xd0] sm:$0xff]  ;;  %v1167_v28 = vld [vmem:[#allocation2 + $0xe8] sm:$0xff] }
  0x53   :  { %v1169_v29 = vld [vmem:[#allocation2 + $0xe0] sm:$0xff]  ;;  %v1175_v30 = vld [vmem:[#allocation2 + $0xf8] sm:$0xff]  ;;  %v1177_v31 = vld [vmem:[#allocation2 + $0xf0] sm:$0xff] }
  0x54   :  { %1685 = vst [vmem:[#allocation22_spill] sm:$0xff] %v1177_v31  ;;  %v1183_v32 = vld [vmem:[#allocation5 + $0x8] sm:$0xff]  ;;  %v1185_v33 = vld [vmem:[#allocation5] sm:$0xff]  ;;  %v1191_v34 = vld [vmem:[#allocation5 + $0x18] sm:$0xff] }
  0x55   :  { %1686 = vst [vmem:[#allocation23_spill] sm:$0xff] %v1183_v32  ;;  %1687 = vst [vmem:[#allocation24_spill] sm:$0xff] %v1185_v33  ;;  %v1193_v35 = vld [vmem:[#allocation5 + $0x10] sm:$0xff]  ;;  %v1199_v36 = vld [vmem:[#allocation5 + $0x28] sm:$0xff] }
  0x56   :  { %219 = vrot.lane.b32.xlu1 %v1079_v6, %s976_s4  ;;  %217 = vrot.lane.b32.xlu0 %v1081_v7, %s976_s4  ;;  %1688 = vst [vmem:[#allocation25_spill] sm:$0xff] %v1191_v34  ;;  %1689 = vst [vmem:[#allocation26_spill] sm:$0xff] %v1193_v35  ;;  %v1201_v37 = vld [vmem:[#allocation5 + $0x20] sm:$0xff]  ;;  %v1207_v38 = vld [vmem:[#allocation5 + $0x38] sm:$0xff] }
  0x57   :  { %1690 = vst [vmem:[#allocation27_spill] sm:$0xff] %v1199_v36  ;;  %1691 = vst [vmem:[#allocation28_spill] sm:$0xff] %v1201_v37  ;;  %v1209_v39 = vld [vmem:[#allocation5 + $0x30] sm:$0xff]  ;;  %v1215_v40 = vld [vmem:[#allocation5 + $0x48] sm:$0xff] }
  0x58   :  { %1692 = vst [vmem:[#allocation29_spill] sm:$0xff] %v1207_v38  ;;  %1693 = vst [vmem:[#allocation30_spill] sm:$0xff] %v1209_v39  ;;  %v1217_v41 = vld [vmem:[#allocation5 + $0x40] sm:$0xff]  ;;  %v1223_v42 = vld [vmem:[#allocation5 + $0x58] sm:$0xff] }
  0x59   :  { %1694 = vst [vmem:[#allocation31_spill] sm:$0xff] %v1215_v40  ;;  %1695 = vst [vmem:[#allocation32_spill] sm:$0xff] %v1217_v41  ;;  %v1225_v43 = vld [vmem:[#allocation5 + $0x50] sm:$0xff]  ;;  %v1231_v44 = vld [vmem:[#allocation5 + $0x68] sm:$0xff] }
  0x5a   :  { %223 = vrot.lane.b32.xlu1 %v1087_v8, %s976_s4  ;;  %221 = vrot.lane.b32.xlu0 %v1089_v9, %s976_s4  ;;  %1696 = vst [vmem:[#allocation33_spill] sm:$0xff] %v1223_v42  ;;  %1697 = vst [vmem:[#allocation34_spill] sm:$0xff] %v1225_v43  ;;  %v1233_v45 = vld [vmem:[#allocation5 + $0x60] sm:$0xff]  ;;  %v1239_v46 = vld [vmem:[#allocation5 + $0x78] sm:$0xff] }
  0x5b   :  { %1698 = vst [vmem:[#allocation35_spill] sm:$0xff] %v1231_v44  ;;  %1699 = vst [vmem:[#allocation36_spill] sm:$0xff] %v1233_v45  ;;  %v1241_v47 = vld [vmem:[#allocation5 + $0x70] sm:$0xff]  ;;  %v1247_v48 = vld [vmem:[#allocation5 + $0x88] sm:$0xff] }
  0x5c   :  { %1700 = vst [vmem:[#allocation37_spill] sm:$0xff] %v1239_v46  ;;  %1701 = vst [vmem:[#allocation38_spill] sm:$0xff] %v1241_v47  ;;  %v1249_v49 = vld [vmem:[#allocation5 + $0x80] sm:$0xff]  ;;  %v1255_v50 = vld [vmem:[#allocation5 + $0x98] sm:$0xff] }
  0x5d   :  { %1702 = vst [vmem:[#allocation39_spill] sm:$0xff] %v1247_v48  ;;  %1703 = vst [vmem:[#allocation40_spill] sm:$0xff] %v1249_v49  ;;  %v1257_v51 = vld [vmem:[#allocation5 + $0x90] sm:$0xff]  ;;  %v1263_v52 = vld [vmem:[#allocation5 + $0xa8] sm:$0xff] }
  0x5e   :  { %227 = vrot.lane.b32.xlu1 %v1095_v10, %s976_s4  ;;  %225 = vrot.lane.b32.xlu0 %v1097_v11, %s976_s4  ;;  %1704 = vst [vmem:[#allocation41_spill] sm:$0xff] %v1255_v50  ;;  %1705 = vst [vmem:[#allocation42_spill] sm:$0xff] %v1257_v51  ;;  %v1265_v53 = vld [vmem:[#allocation5 + $0xa0] sm:$0xff]  ;;  %v1271_v54 = vld [vmem:[#allocation5 + $0xb8] sm:$0xff] }
  0x5f   :  { %1706 = vst [vmem:[#allocation43_spill] sm:$0xff] %v1263_v52  ;;  %1707 = vst [vmem:[#allocation44_spill] sm:$0xff] %v1265_v53  ;;  %v1273_v55 = vld [vmem:[#allocation5 + $0xb0] sm:$0xff]  ;;  %v1279_v56 = vld [vmem:[#allocation5 + $0xc8] sm:$0xff] }
  0x60   :  { %1708 = vst [vmem:[#allocation45_spill] sm:$0xff] %v1271_v54  ;;  %1709 = vst [vmem:[#allocation46_spill] sm:$0xff] %v1273_v55  ;;  %v1281_v57 = vld [vmem:[#allocation5 + $0xc0] sm:$0xff]  ;;  %v1283_v58 = vld [vmem:[#allocation7 + $0x10] sm:$0xff] }
  0x61   :  { %1710 = vst [vmem:[#allocation47_spill] sm:$0xff] %v1279_v56  ;;  %1711 = vst [vmem:[#allocation48_spill] sm:$0xff] %v1281_v57  ;;  %v1285_v59 = vld [vmem:[#allocation7] sm:$0xff]  ;;  %v1291_v60 = vld [vmem:[#allocation8 + $0x10] sm:$0xff]  ;;  %v447_v62 = vmul.f32 %v1283_v58, %v1055_v0 }
  0x62   :  { %231 = vrot.lane.b32.xlu1 %v1103_v12, %s976_s4  ;;  %229 = vrot.lane.b32.xlu0 %v1105_v13, %s976_s4  ;;  %v1293_v61 = vld [vmem:[#allocation8] sm:$0xff]  ;;  %v445_v63 = vmul.f32 %v1285_v59, %v1057_v1  ;;  %v1313_v0 = vld [vmem:[#allocation8 + $0x18] sm:$0xff]  ;;  %v1315_v1 = vld [vmem:[#allocation8 + $0x8] sm:$0xff] }
  0x66   :  { %235 = vrot.lane.b32.xlu1 %v1111_v14, %s976_s4  ;;  %233 = vrot.lane.b32.xlu0 %v1113_v15, %s976_s4 }
  0x6a   :  { %239 = vrot.lane.b32.xlu1 %v1119_v16, %s976_s4  ;;  %237 = vrot.lane.b32.xlu0 %v1121_v17, %s976_s4 }
  0x6e   :  { %243 = vrot.lane.b32.xlu1 %v1127_v18, %s976_s4  ;;  %241 = vrot.lane.b32.xlu0 %v1129_v19, %s976_s4 }
  0x72   :  { %247 = vrot.lane.b32.xlu1 %v1135_v20, %s976_s4  ;;  %245 = vrot.lane.b32.xlu0 %v1137_v21, %s976_s4 }
  0x76   :  { %251 = vrot.lane.b32.xlu1 %v1143_v22, %s976_s4  ;;  %249 = vrot.lane.b32.xlu0 %v1145_v23, %s976_s4 }
  0x7a   :  { %255 = vrot.lane.b32.xlu1 %v1151_v24, %s976_s4  ;;  %253 = vrot.lane.b32.xlu0 %v1153_v25, %s976_s4 }
  0x7e   :  { %259 = vrot.lane.b32.xlu1 %v1159_v26, %s976_s4  ;;  %257 = vrot.lane.b32.xlu0 %v1161_v27, %s976_s4 }
  0x82   :  { %263 = vrot.lane.b32.xlu1 %v1167_v28, %s976_s4  ;;  %261 = vrot.lane.b32.xlu0 %v1169_v29, %s976_s4 }
  0x86   :  { %267 = vrot.lane.b32.xlu1 %v1175_v30, %s976_s4  ;;  %265 = vrot.lane.b32.xlu0 %v1177_v31, %s976_s4 }
  0x8a   :  { %335 = vrot.lane.b32.xlu1 %v1183_v32, %s976_s4  ;;  %333 = vrot.lane.b32.xlu0 %v1185_v33, %s976_s4  ;;  %v1413_v33 = vld [vmem:[#allocation8 + $0x78] sm:$0xff] }
  0x8e   :  { %339 = vrot.lane.b32.xlu1 %v1191_v34, %s976_s4  ;;  %337 = vrot.lane.b32.xlu0 %v1193_v35, %s976_s4  ;;  %v1399_v35 = vld [vmem:[#allocation8 + $0x68] sm:$0xff] }
  0x92   :  { %343 = vrot.lane.b32.xlu1 %v1199_v36, %s976_s4  ;;  %341 = vrot.lane.b32.xlu0 %v1201_v37, %s976_s4  ;;  %v1385_v37 = vld [vmem:[#allocation8 + $0x58] sm:$0xff] }
  0x96   :  { %347 = vrot.lane.b32.xlu1 %v1207_v38, %s976_s4  ;;  %345 = vrot.lane.b32.xlu0 %v1209_v39, %s976_s4  ;;  %v1371_v39 = vld [vmem:[#allocation8 + $0x48] sm:$0xff] }
  0x9a   :  { %351 = vrot.lane.b32.xlu1 %v1215_v40, %s976_s4  ;;  %349 = vrot.lane.b32.xlu0 %v1217_v41, %s976_s4 }
  0x9e   :  { %355 = vrot.lane.b32.xlu1 %v1223_v42, %s976_s4  ;;  %353 = vrot.lane.b32.xlu0 %v1225_v43, %s976_s4 }
  0xa2   :  { %359 = vrot.lane.b32.xlu1 %v1231_v44, %s976_s4  ;;  %357 = vrot.lane.b32.xlu0 %v1233_v45, %s976_s4  ;;  %v1327_v45 = vld [vmem:[#allocation7 + $0x20] sm:$0xff] }
  0xa6   :  { %363 = vrot.lane.b32.xlu1 %v1239_v46, %s976_s4  ;;  %361 = vrot.lane.b32.xlu0 %v1241_v47, %s976_s4  ;;  %v1321_v46 = vld [vmem:[#allocation5 + $0xe8] sm:$0xff] }
  0xa7   :  { %1714 = vst [vmem:[#allocation51_spill] sm:$0xff] %v1321_v46 }
  0xaa   :  { %367 = vrot.lane.b32.xlu1 %v1247_v48, %s976_s4  ;;  %365 = vrot.lane.b32.xlu0 %v1249_v49, %s976_s4 }
  0xae   :  { %371 = vrot.lane.b32.xlu1 %v1255_v50, %s976_s4  ;;  %369 = vrot.lane.b32.xlu0 %v1257_v51, %s976_s4 }
  0xb2   :  { %375 = vrot.lane.b32.xlu1 %v1263_v52, %s976_s4  ;;  %373 = vrot.lane.b32.xlu0 %v1265_v53, %s976_s4  ;;  %v1303_v53 = vld [vmem:[#allocation7 + $0x18] sm:$0xff] }
  0xb3   :  { %v448_v49 = vmul.f32 %v1303_v53, %v1063_v2 }
  0xb6   :  { %379 = vrot.lane.b32.xlu1 %v1271_v54, %s976_s4  ;;  %377 = vrot.lane.b32.xlu0 %v1273_v55, %s976_s4  ;;  %v1299_v55 = vld [vmem:[#allocation5 + $0xd8] sm:$0xff]  ;;  %v1301_v54 = vld [vmem:[#allocation5 + $0xd0] sm:$0xff] }
  0xb7   :  { %1712 = vst [vmem:[#allocation49_spill] sm:$0xff] %v1299_v55  ;;  %1713 = vst [vmem:[#allocation50_spill] sm:$0xff] %v1301_v54 }
  0xba   :  { %383 = vrot.lane.b32.xlu1 %v1279_v56, %s976_s4  ;;  %381 = vrot.lane.b32.xlu0 %v1281_v57, %s976_s4  ;;  %v1305_v56 = vld [vmem:[#allocation7 + $0x8] sm:$0xff] }
  0xbb   :  { %v446_v48 = vmul.f32 %v1305_v56, %v1065_v3  ;;  %v1335_v3 = vld [vmem:[#allocation8 + $0x28] sm:$0xff] }
  0xbc   :  { %v210_v52 = vpop.permute.xlu1 %209  ;;  %v206_v57 = vpop.permute.xlu0 %205 }
  0xbd   :  { %v495_v51 = vmul.f32 %v1291_v60, %v210_v52  ;;  %v493_v50 = vmul.f32 %v1293_v61, %v206_v57  ;;  %v1323_v57 = vld [vmem:[#allocation5 + $0xe0] sm:$0xff] }
  0xbe   :  { %387 = vrot.lane.b32.xlu1 %v1299_v55, %s976_s4  ;;  %385 = vrot.lane.b32.xlu0 %v1301_v54, %s976_s4  ;;  %1715 = vst [vmem:[#allocation52_spill] sm:$0xff] %v1323_v57  ;;  %v1325_v55 = vld [vmem:[#allocation7 + $0x28] sm:$0xff] }
  0xbf   :  { %v527_v47 = vadd.f32 %v495_v51, %v447_v62  ;;  %v525_v52 = vadd.f32 %v493_v50, %v445_v63  ;;  %v1337_v50 = vld [vmem:[#allocation8 + $0x20] sm:$0xff]  ;;  %v450_v51 = vmul.f32 %v1325_v55, %v1071_v4  ;;  %v1343_v63 = vld [vmem:[#allocation5 + $0xf8] sm:$0xff] }
  0xc0   :  { %v212_v54 = vpop.permute.xlu1 %211  ;;  %v208_v44 = vpop.permute.xlu0 %207  ;;  %1716 = vst [vmem:[#allocation53_spill] sm:$0xff] %v1343_v63 }
  0xc1   :  { %559 = vst [vmem:[#allocation13 + $0x10] sm:$0xff] %v527_v47  ;;  %557 = vst [vmem:[#allocation13] sm:$0xff] %v525_v52  ;;  %v496_v43 = vmul.f32 %v1313_v0, %v212_v54  ;;  %v494_v2 = vmul.f32 %v1315_v1, %v208_v44  ;;  %v449_v47 = vmul.f32 %v1327_v45, %v1073_v5  ;;  %v1345_v44 = vld [vmem:[#allocation5 + $0xf0] sm:$0xff]  ;;  %v1347_v52 = vld [vmem:[#allocation7 + $0x38] sm:$0xff] }
  0xc2   :  { %391 = vrot.lane.b32.xlu1 %v1321_v46, %s976_s4  ;;  %389 = vrot.lane.b32.xlu0 %v1323_v57, %s976_s4  ;;  %1717 = vst [vmem:[#allocation54_spill] sm:$0xff] %v1345_v44  ;;  %v1349_v46 = vld [vmem:[#allocation7 + $0x30] sm:$0xff]  ;;  %v1357_v5 = vld [vmem:[#allocation8 + $0x38] sm:$0xff] }
  0xc3   :  { %v528_v62 = vadd.f32 %v496_v43, %v448_v49  ;;  %v526_v54 = vadd.f32 %v494_v2, %v446_v48  ;;  %v1359_v43 = vld [vmem:[#allocation8 + $0x30] sm:$0xff]  ;;  %v452_v48 = vmul.f32 %v1347_v52, %v1079_v6  ;;  %v451_v49 = vmul.f32 %v1349_v46, %v1081_v7  ;;  %v1373_v6 = vld [vmem:[#allocation8 + $0x40] sm:$0xff] }
  0xc4   :  { %v216_v57 = vpop.permute.xlu1 %215  ;;  %v214_v42 = vpop.permute.xlu0 %213 }
  0xc5   :  { %560 = vst [vmem:[#allocation13 + $0x18] sm:$0xff] %v528_v62  ;;  %558 = vst [vmem:[#allocation13 + $0x8] sm:$0xff] %v526_v54  ;;  %v498_v41 = vmul.f32 %v1335_v3, %v216_v57  ;;  %v497_v4 = vmul.f32 %v1337_v50, %v214_v42  ;;  %v1365_v62 = vld [vmem:[#allocation7 + $0x48] sm:$0xff]  ;;  %v1367_v42 = vld [vmem:[#allocation7 + $0x40] sm:$0xff] }
  0xc6   :  { %395 = vrot.lane.b32.xlu1 %v1343_v63, %s976_s4  ;;  %393 = vrot.lane.b32.xlu0 %v1345_v44, %s976_s4  ;;  %v454_v7 = vmul.f32 %v1365_v62, %v1087_v8  ;;  %v1387_v8 = vld [vmem:[#allocation8 + $0x50] sm:$0xff] }
  0xc7   :  { %v530_v2 = vadd.f32 %v498_v41, %v450_v51  ;;  %v529_v57 = vadd.f32 %v497_v4, %v449_v47  ;;  %v453_v41 = vmul.f32 %v1367_v42, %v1089_v9  ;;  %v1379_v4 = vld [vmem:[#allocation7 + $0x58] sm:$0xff] }
  0xc8   :  { %v220_v54 = vpop.permute.xlu1 %219  ;;  %v218_v63 = vpop.permute.xlu0 %217  ;;  %v456_v9 = vmul.f32 %v1379_v4, %v1095_v10  ;;  %v1401_v10 = vld [vmem:[#allocation8 + $0x60] sm:$0xff] }
  0xc9   :  { %562 = vst [vmem:[#allocation13 + $0x28] sm:$0xff] %v530_v2  ;;  %561 = vst [vmem:[#allocation13 + $0x20] sm:$0xff] %v529_v57  ;;  %v500_v44 = vmul.f32 %v1357_v5, %v220_v54  ;;  %v499_v40 = vmul.f32 %v1359_v43, %v218_v63  ;;  %v1381_v2 = vld [vmem:[#allocation7 + $0x50] sm:$0xff] }
  0xcb   :  { %v532_v51 = vadd.f32 %v500_v44, %v452_v48  ;;  %v531_v47 = vadd.f32 %v499_v40, %v451_v49  ;;  %v455_v40 = vmul.f32 %v1381_v2, %v1097_v11  ;;  %v1393_v49 = vld [vmem:[#allocation7 + $0x68] sm:$0xff] }
  0xcc   :  { %v224_v57 = vpop.permute.xlu1 %223  ;;  %v222_v54 = vpop.permute.xlu0 %221  ;;  %v458_v11 = vmul.f32 %v1393_v49, %v1103_v12  ;;  %v1415_v12 = vld [vmem:[#allocation8 + $0x70] sm:$0xff] }
  0xcd   :  { %564 = vst [vmem:[#allocation13 + $0x38] sm:$0xff] %v532_v51  ;;  %563 = vst [vmem:[#allocation13 + $0x30] sm:$0xff] %v531_v47  ;;  %v502_v63 = vmul.f32 %v1371_v39, %v224_v57  ;;  %v501_v38 = vmul.f32 %v1373_v6, %v222_v54  ;;  %v1395_v51 = vld [vmem:[#allocation7 + $0x60] sm:$0xff] }
  0xcf   :  { %v534_v44 = vadd.f32 %v502_v63, %v454_v7  ;;  %v533_v48 = vadd.f32 %v501_v38, %v453_v41  ;;  %v457_v38 = vmul.f32 %v1395_v51, %v1105_v13  ;;  %v1407_v63 = vld [vmem:[#allocation7 + $0x78] sm:$0xff] }
  0xd0   :  { %v228_v47 = vpop.permute.xlu1 %227  ;;  %v226_v57 = vpop.permute.xlu0 %225  ;;  %1718 = vst [vmem:[#allocation55_spill] sm:$0xff] %v1407_v63  ;;  %v460_v13 = vmul.f32 %v1407_v63, %v1111_v14 }
  0xd1   :  { %566 = vst [vmem:[#allocation13 + $0x48] sm:$0xff] %v534_v44  ;;  %565 = vst [vmem:[#allocation13 + $0x40] sm:$0xff] %v533_v48  ;;  %v504_v54 = vmul.f32 %v1385_v37, %v228_v47  ;;  %v503_v36 = vmul.f32 %v1387_v8, %v226_v57  ;;  %v1409_v44 = vld [vmem:[#allocation7 + $0x70] sm:$0xff] }
  0xd3   :  { %v536_v7 = vadd.f32 %v504_v54, %v456_v9  ;;  %v535_v41 = vadd.f32 %v503_v36, %v455_v40  ;;  %v459_v36 = vmul.f32 %v1409_v44, %v1113_v15 }
  0xd4   :  { %v232_v48 = vpop.permute.xlu1 %231  ;;  %v230_v47 = vpop.permute.xlu0 %229 }
  0xd5   :  { %568 = vst [vmem:[#allocation13 + $0x58] sm:$0xff] %v536_v7  ;;  %567 = vst [vmem:[#allocation13 + $0x50] sm:$0xff] %v535_v41  ;;  %v506_v57 = vmul.f32 %v1399_v35, %v232_v48  ;;  %v505_v34 = vmul.f32 %v1401_v10, %v230_v47  ;;  %v462_v48 = vmul.f32 %v1305_v56, %v1119_v16 }
  0xd6   :  { %v461_v47 = vmul.f32 %v1285_v59, %v1121_v17 }
  0xd7   :  { %v538_v9 = vadd.f32 %v506_v57, %v458_v11  ;;  %v537_v40 = vadd.f32 %v505_v34, %v457_v38  ;;  %v464_v38 = vmul.f32 %v1303_v53, %v1127_v18 }
  0xd8   :  { %v236_v54 = vpop.permute.xlu1 %235  ;;  %v234_v32 = vpop.permute.xlu0 %233 }
  0xd9   :  { %570 = vst [vmem:[#allocation13 + $0x68] sm:$0xff] %v538_v9  ;;  %569 = vst [vmem:[#allocation13 + $0x60] sm:$0xff] %v537_v40  ;;  %v508_v7 = vmul.f32 %v1413_v33, %v236_v54  ;;  %v507_v41 = vmul.f32 %v1415_v12, %v234_v32  ;;  %v463_v32 = vmul.f32 %v1283_v58, %v1129_v19 }
  0xdb   :  { %v540_v14 = vadd.f32 %v508_v7, %v460_v13  ;;  %v539_v31 = vadd.f32 %v507_v41, %v459_v36 }
  0xdc   :  { %v240_v63 = vpop.permute.xlu1 %239  ;;  %v238_v15 = vpop.permute.xlu0 %237 }
  0xdd   :  { %572 = vst [vmem:[#allocation13 + $0x78] sm:$0xff] %v540_v14  ;;  %571 = vst [vmem:[#allocation13 + $0x70] sm:$0xff] %v539_v31  ;;  %v510_v34 = vmul.f32 %v1315_v1, %v240_v63  ;;  %v509_v11 = vmul.f32 %v1293_v61, %v238_v15  ;;  %v466_v1 = vmul.f32 %v1325_v55, %v1135_v20 }
  0xde   :  { %v465_v61 = vmul.f32 %v1327_v45, %v1137_v21 }
  0xdf   :  { %v542_v16 = vadd.f32 %v510_v34, %v462_v48  ;;  %v541_v56 = vadd.f32 %v509_v11, %v461_v47  ;;  %v1469_v34 = vld [vmem:[#allocation10 + $0x8] sm:$0xff] }
  0xe0   :  { %v244_v57 = vpop.permute.xlu1 %243  ;;  %v242_v17 = vpop.permute.xlu0 %241 }
  0xe1   :  { %574 = vst [vmem:[#allocation13 + $0x88] sm:$0xff] %v542_v16  ;;  %573 = vst [vmem:[#allocation13 + $0x80] sm:$0xff] %v541_v56  ;;  %v512_v59 = vmul.f32 %v1313_v0, %v244_v57  ;;  %v511_v31 = vmul.f32 %v1291_v60, %v242_v17  ;;  %v468_v0 = vmul.f32 %v1347_v52, %v1143_v22  ;;  %v1722_v16 = vld [vmem:[#allocation24_spill] sm:$0xff] }
  0xe2   :  { %v467_v60 = vmul.f32 %v1349_v46, %v1145_v23 }
  0xe3   :  { %v544_v18 = vadd.f32 %v512_v59, %v464_v38  ;;  %v543_v53 = vadd.f32 %v511_v31, %v463_v32  ;;  %v1477_v38 = vld [vmem:[#allocation11] sm:$0xff]  ;;  %v1483_v59 = vld [vmem:[#allocation10 + $0x18] sm:$0xff]  ;;  %v1485_v31 = vld [vmem:[#allocation10 + $0x10] sm:$0xff] }
  0xe4   :  { %v248_v63 = vpop.permute.xlu1 %247  ;;  %v246_v19 = vpop.permute.xlu0 %245 }
  0xe5   :  { %576 = vst [vmem:[#allocation13 + $0x98] sm:$0xff] %v544_v18  ;;  %575 = vst [vmem:[#allocation13 + $0x90] sm:$0xff] %v543_v53  ;;  %v514_v58 = vmul.f32 %v1335_v3, %v248_v63  ;;  %v513_v13 = vmul.f32 %v1337_v50, %v246_v19  ;;  %v470_v3 = vmul.f32 %v1365_v62, %v1151_v24  ;;  %v1489_v18 = vld [vmem:[#allocation11 + $0x18] sm:$0xff]  ;;  %v1491_v53 = vld [vmem:[#allocation11 + $0x10] sm:$0xff] }
  0xe6   :  { %v469_v50 = vmul.f32 %v1367_v42, %v1153_v25 }
  0xe7   :  { %v546_v20 = vadd.f32 %v514_v58, %v466_v1  ;;  %v545_v55 = vadd.f32 %v513_v13, %v465_v61 }
  0xe8   :  { %v252_v36 = vpop.permute.xlu1 %251  ;;  %v250_v21 = vpop.permute.xlu0 %249 }
  0xe9   :  { %578 = vst [vmem:[#allocation13 + $0xa8] sm:$0xff] %v546_v20  ;;  %577 = vst [vmem:[#allocation13 + $0xa0] sm:$0xff] %v545_v55  ;;  %v516_v45 = vmul.f32 %v1357_v5, %v252_v36  ;;  %v515_v9 = vmul.f32 %v1359_v43, %v250_v21  ;;  %v472_v5 = vmul.f32 %v1379_v4, %v1159_v26 }
  0xea   :  { %v471_v43 = vmul.f32 %v1381_v2, %v1161_v27 }
  0xeb   :  { %v548_v22 = vadd.f32 %v516_v45, %v468_v0  ;;  %v547_v52 = vadd.f32 %v515_v9, %v467_v60 }
  0xec   :  { %v256_v40 = vpop.permute.xlu1 %255  ;;  %v254_v23 = vpop.permute.xlu0 %253 }
  0xed   :  { %580 = vst [vmem:[#allocation13 + $0xb8] sm:$0xff] %v548_v22  ;;  %579 = vst [vmem:[#allocation13 + $0xb0] sm:$0xff] %v547_v52  ;;  %v518_v46 = vmul.f32 %v1371_v39, %v256_v40  ;;  %v517_v54 = vmul.f32 %v1373_v6, %v254_v23  ;;  %v474_v39 = vmul.f32 %v1393_v49, %v1167_v28 }
  0xee   :  { %v473_v6 = vmul.f32 %v1395_v51, %v1169_v29  ;;  %v1471_v29 = vld [vmem:[#allocation10] sm:$0xff] }
  0xef   :  { %v550_v24 = vadd.f32 %v518_v46, %v470_v3  ;;  %v549_v62 = vadd.f32 %v517_v54, %v469_v50  ;;  %v605_v56 = vmul.f32 %v1471_v29, %v1722_v16 }
  0xf0   :  { %v260_v7 = vpop.permute.xlu1 %259  ;;  %v258_v25 = vpop.permute.xlu0 %257 }
  0xf1   :  { %582 = vst [vmem:[#allocation13 + $0xc8] sm:$0xff] %v550_v24  ;;  %581 = vst [vmem:[#allocation13 + $0xc0] sm:$0xff] %v549_v62  ;;  %v520_v42 = vmul.f32 %v1385_v37, %v260_v7  ;;  %v519_v41 = vmul.f32 %v1387_v8, %v258_v25  ;;  %v1719_v37 = vld [vmem:[#allocation55_spill] sm:$0xff]  ;;  %v1720_v8 = vld [vmem:[#allocation22_spill] sm:$0xff] }
  0xf2   :  { %v476_v14 = vmul.f32 %v1719_v37, %v1175_v30  ;;  %v475_v15 = vmul.f32 %v1409_v44, %v1720_v8  ;;  %v1475_v30 = vld [vmem:[#allocation11 + $0x8] sm:$0xff] }
  0xf3   :  { %v552_v26 = vadd.f32 %v520_v42, %v472_v5  ;;  %v551_v4 = vadd.f32 %v519_v41, %v471_v43  ;;  %v1721_v44 = vld [vmem:[#allocation23_spill] sm:$0xff] }
  0xf4   :  { %v264_v48 = vpop.permute.xlu1 %263  ;;  %v262_v27 = vpop.permute.xlu0 %261  ;;  %v606_v32 = vmul.f32 %v1469_v34, %v1721_v44 }
  0xf5   :  { %584 = vst [vmem:[#allocation13 + $0xd8] sm:$0xff] %v552_v26  ;;  %583 = vst [vmem:[#allocation13 + $0xd0] sm:$0xff] %v551_v4  ;;  %v522_v2 = vmul.f32 %v1399_v35, %v264_v48  ;;  %v521_v47 = vmul.f32 %v1401_v10, %v262_v27 }
  0xf7   :  { %v554_v28 = vadd.f32 %v522_v2, %v474_v39  ;;  %v553_v49 = vadd.f32 %v521_v47, %v473_v6 }
  0xf8   :  { %v268_v51 = vpop.permute.xlu1 %267  ;;  %v266_v11 = vpop.permute.xlu0 %265 }
  0xf9   :  { %586 = vst [vmem:[#allocation13 + $0xe8] sm:$0xff] %v554_v28  ;;  %585 = vst [vmem:[#allocation13 + $0xe0] sm:$0xff] %v553_v49  ;;  %v524_v35 = vmul.f32 %v1413_v33, %v268_v51  ;;  %v523_v10 = vmul.f32 %v1415_v12, %v266_v11 }
  0xfb   :  { %v556_v57 = vadd.f32 %v524_v35, %v476_v14  ;;  %v555_v17 = vadd.f32 %v523_v10, %v475_v15 }
  0xfc   :  { %v336_v33 = vpop.permute.xlu1 %335  ;;  %v334_v1 = vpop.permute.xlu0 %333 }
  0xfd   :  { %588 = vst [vmem:[#allocation13 + $0xf8] sm:$0xff] %v556_v57  ;;  %587 = vst [vmem:[#allocation13 + $0xf0] sm:$0xff] %v555_v17  ;;  %v654_v12 = vmul.f32 %v1475_v30, %v336_v33  ;;  %v653_v61 = vmul.f32 %v1477_v38, %v334_v1 }
  0xfe   :  { %927 = shalt.err (!%p924_p6)
}
  0xff   :  { %760 = dma.vmem_to_hbm [thread:$0]  %s755_s8, 4096, %s1649_s6, [#allocation4], %s970_s29, %s970_s29, %s971_s30   ;;  %v1723_v63 = vld [vmem:[#allocation25_spill] sm:$0xff]  ;;  %v1724_v58 = vld [vmem:[#allocation26_spill] sm:$0xff]  ;;  %v686_v0 = vadd.f32 %v654_v12, %v606_v32  ;;  %v685_v60 = vadd.f32 %v653_v61, %v605_v56  ;;  %v1503_v20 = vld [vmem:[#allocation10 + $0x28] sm:$0xff] }
 0x100   :  { %v608_v19 = vmul.f32 %v1483_v59, %v1723_v63  ;;  %v607_v13 = vmul.f32 %v1485_v31, %v1724_v58  ;;  %v1505_v55 = vld [vmem:[#allocation10 + $0x20] sm:$0xff]  ;;  %v340_v36 = vpop.permute.xlu1 %339  ;;  %v338_v21 = vpop.permute.xlu0 %337  ;;  %v1509_v3 = vld [vmem:[#allocation11 + $0x28] sm:$0xff]  ;;  %v1726_v40 = vld [vmem:[#allocation28_spill] sm:$0xff]  ;;  %s978_s6 = smov [#allocation14]  }
 0x101   :  { %718 = vst [vmem:[#allocation14 + $0x8] sm:$0xff] %v686_v0  ;;  %717 = vst [vmem:[#allocation14] sm:$0xff] %v685_v60  ;;  %v656_v45 = vmul.f32 %v1489_v18, %v340_v36  ;;  %v655_v9 = vmul.f32 %v1491_v53, %v338_v21  ;;  %v1511_v50 = vld [vmem:[#allocation11 + $0x20] sm:$0xff]  ;;  %v1725_v22 = vld [vmem:[#allocation27_spill] sm:$0xff]  ;;  %v609_v23 = vmul.f32 %v1505_v55, %v1726_v40  ;;  %s766_s12 = sshll.u32 %s978_s6, 4  ;;  %s767_s12 = int_to_ptr.vmem [resolvable:$true] %s766_s12 }
 0x102   :  { %v610_v52 = vmul.f32 %v1503_v20, %v1725_v22  ;;  %v1517_v5 = vld [vmem:[#allocation10 + $0x38] sm:$0xff]  ;;  %v1519_v43 = vld [vmem:[#allocation10 + $0x30] sm:$0xff]  ;;  %v1728_v26 = vld [vmem:[#allocation30_spill] sm:$0xff]  ;;  %s936_s13 = scalar_lea.vmem %s767_s12, 4096  ;;  %p941_p8 = scmp.lt.s32.totalorder %s767_s12, %s767_s12 }
 0x103   :  { %v688_v46 = vadd.f32 %v656_v45, %v608_v19  ;;  %v687_v54 = vadd.f32 %v655_v9, %v607_v13  ;;  %v1523_v42 = vld [vmem:[#allocation11 + $0x38] sm:$0xff]  ;;  %v1525_v41 = vld [vmem:[#allocation11 + $0x30] sm:$0xff]  ;;  %v611_v4 = vmul.f32 %v1519_v43, %v1728_v26  ;;  %v1531_v2 = vld [vmem:[#allocation10 + $0x48] sm:$0xff]  ;;  %p937_p7 = scmp.ne.s32.totalorder %s767_s12, %s936_s13  ;;  %p942_p9 = scmp.lt.s32.totalorder %s936_s13, %s936_s13 }
 0x104   :  { %v344_v24 = vpop.permute.xlu1 %343  ;;  %v342_v62 = vpop.permute.xlu0 %341  ;;  %v1727_v39 = vld [vmem:[#allocation29_spill] sm:$0xff]  ;;  %v1533_v47 = vld [vmem:[#allocation10 + $0x40] sm:$0xff]  ;;  %v1537_v28 = vld [vmem:[#allocation11 + $0x48] sm:$0xff] }
 0x105   :  { %720 = vst [vmem:[#allocation14 + $0x18] sm:$0xff] %v688_v46  ;;  %719 = vst [vmem:[#allocation14 + $0x10] sm:$0xff] %v687_v54  ;;  %v658_v7 = vmul.f32 %v1509_v3, %v344_v24  ;;  %v657_v25 = vmul.f32 %v1511_v50, %v342_v62  ;;  %v612_v6 = vmul.f32 %v1517_v5, %v1727_v39  ;;  %v1539_v49 = vld [vmem:[#allocation11 + $0x40] sm:$0xff]  ;;  %v1729_v51 = vld [vmem:[#allocation31_spill] sm:$0xff]  ;;  %p943_p10 = por %p942_p9, %p941_p8 }
 0x106   :  { %v614_v11 = vmul.f32 %v1531_v2, %v1729_v51  ;;  %v1730_v35 = vld [vmem:[#allocation32_spill] sm:$0xff]  ;;  %v1545_v16 = vld [vmem:[#allocation10 + $0x58] sm:$0xff]  ;;  %v1732_v58 = vld [vmem:[#allocation34_spill] sm:$0xff] }
 0x107   :  { %v690_v48 = vadd.f32 %v658_v7, %v610_v52  ;;  %v689_v27 = vadd.f32 %v657_v25, %v609_v23  ;;  %v613_v10 = vmul.f32 %v1533_v47, %v1730_v35  ;;  %v1547_v56 = vld [vmem:[#allocation10 + $0x50] sm:$0xff]  ;;  %v1551_v12 = vld [vmem:[#allocation11 + $0x58] sm:$0xff]  ;;  %v1559_v36 = vld [vmem:[#allocation10 + $0x68] sm:$0xff]  ;;  %p944_p11 = pnand %p943_p10, %p937_p7 }
 0x108   :  { %v348_v37 = vpop.permute.xlu1 %347  ;;  %v346_v14 = vpop.permute.xlu0 %345  ;;  %v1553_v61 = vld [vmem:[#allocation11 + $0x50] sm:$0xff]  ;;  %v1731_v63 = vld [vmem:[#allocation33_spill] sm:$0xff]  ;;  %v615_v13 = vmul.f32 %v1547_v56, %v1732_v58  ;;  %v1561_v21 = vld [vmem:[#allocation10 + $0x60] sm:$0xff] }
 0x109   :  { %722 = vst [vmem:[#allocation14 + $0x28] sm:$0xff] %v690_v48  ;;  %721 = vst [vmem:[#allocation14 + $0x20] sm:$0xff] %v689_v27  ;;  %v660_v8 = vmul.f32 %v1523_v42, %v348_v37  ;;  %v659_v15 = vmul.f32 %v1525_v41, %v346_v14  ;;  %v616_v19 = vmul.f32 %v1545_v16, %v1731_v63  ;;  %v1565_v40 = vld [vmem:[#allocation11 + $0x68] sm:$0xff]  ;;  %v1567_v23 = vld [vmem:[#allocation11 + $0x60] sm:$0xff] }
 0x10a   :  { %v1733_v46 = vld [vmem:[#allocation35_spill] sm:$0xff]  ;;  %v1734_v24 = vld [vmem:[#allocation36_spill] sm:$0xff]  ;;  %v1573_v39 = vld [vmem:[#allocation10 + $0x78] sm:$0xff] }
 0x10b   :  { %v692_v44 = vadd.f32 %v660_v8, %v612_v6  ;;  %v691_v32 = vadd.f32 %v659_v15, %v611_v4  ;;  %v618_v54 = vmul.f32 %v1559_v36, %v1733_v46  ;;  %v617_v62 = vmul.f32 %v1561_v21, %v1734_v24  ;;  %v1575_v6 = vld [vmem:[#allocation10 + $0x70] sm:$0xff]  ;;  %v1579_v37 = vld [vmem:[#allocation11 + $0x78] sm:$0xff]  ;;  %v1736_v51 = vld [vmem:[#allocation38_spill] sm:$0xff] }
 0x10c   :  { %v352_v57 = vpop.permute.xlu1 %351  ;;  %v350_v17 = vpop.permute.xlu0 %349  ;;  %v1581_v14 = vld [vmem:[#allocation11 + $0x70] sm:$0xff]  ;;  %v1735_v8 = vld [vmem:[#allocation37_spill] sm:$0xff]  ;;  %v1740_v46 = vld [vmem:[#allocation42_spill] sm:$0xff] }
 0x10d   :  { %724 = vst [vmem:[#allocation14 + $0x38] sm:$0xff] %v692_v44  ;;  %723 = vst [vmem:[#allocation14 + $0x30] sm:$0xff] %v691_v32  ;;  %v662_v33 = vmul.f32 %v1537_v28, %v352_v57  ;;  %v661_v1 = vmul.f32 %v1539_v49, %v350_v17  ;;  %v620_v15 = vmul.f32 %v1573_v39, %v1735_v8  ;;  %v1738_v63 = vld [vmem:[#allocation40_spill] sm:$0xff] }
 0x10f   :  { %v694_v0 = vadd.f32 %v662_v33, %v614_v11  ;;  %v693_v60 = vadd.f32 %v661_v1, %v613_v10  ;;  %v619_v11 = vmul.f32 %v1575_v6, %v1736_v51  ;;  %v1737_v33 = vld [vmem:[#allocation39_spill] sm:$0xff]  ;;  %v1743_v51 = vld [vmem:[#allocation45_spill] sm:$0xff] }
 0x110   :  { %v356_v45 = vpop.permute.xlu1 %355  ;;  %v354_v9 = vpop.permute.xlu0 %353  ;;  %v622_v1 = vmul.f32 %v1469_v34, %v1737_v33 }
 0x111   :  { %726 = vst [vmem:[#allocation14 + $0x48] sm:$0xff] %v694_v0  ;;  %725 = vst [vmem:[#allocation14 + $0x40] sm:$0xff] %v693_v60  ;;  %v664_v22 = vmul.f32 %v1551_v12, %v356_v45  ;;  %v663_v52 = vmul.f32 %v1553_v61, %v354_v9 }
 0x113   :  { %v696_v7 = vadd.f32 %v664_v22, %v616_v19  ;;  %v695_v25 = vadd.f32 %v663_v52, %v615_v13  ;;  %v621_v19 = vmul.f32 %v1471_v29, %v1738_v63  ;;  %v1739_v22 = vld [vmem:[#allocation41_spill] sm:$0xff] }
 0x114   :  { %v360_v26 = vpop.permute.xlu1 %359  ;;  %v358_v4 = vpop.permute.xlu0 %357  ;;  %v624_v52 = vmul.f32 %v1483_v59, %v1739_v22  ;;  %v1749_v22 = vld [vmem:[#allocation51_spill] sm:$0xff] }
 0x115   :  { %728 = vst [vmem:[#allocation14 + $0x58] sm:$0xff] %v696_v7  ;;  %727 = vst [vmem:[#allocation14 + $0x50] sm:$0xff] %v695_v25  ;;  %v666_v48 = vmul.f32 %v1565_v40, %v360_v26  ;;  %v665_v27 = vmul.f32 %v1567_v23, %v358_v4  ;;  %v1741_v26 = vld [vmem:[#allocation43_spill] sm:$0xff] }
 0x117   :  { %v698_v35 = vadd.f32 %v666_v48, %v618_v54  ;;  %v697_v10 = vadd.f32 %v665_v27, %v617_v62  ;;  %v623_v54 = vmul.f32 %v1485_v31, %v1740_v46 }
 0x118   :  { %v364_v44 = vpop.permute.xlu1 %363  ;;  %v362_v32 = vpop.permute.xlu0 %361 }
 0x119   :  { %730 = vst [vmem:[#allocation14 + $0x68] sm:$0xff] %v698_v35  ;;  %729 = vst [vmem:[#allocation14 + $0x60] sm:$0xff] %v697_v10  ;;  %v668_v57 = vmul.f32 %v1579_v37, %v364_v44  ;;  %v667_v17 = vmul.f32 %v1581_v14, %v362_v32 }
 0x11b   :  { %v700_v58 = vadd.f32 %v668_v57, %v620_v15  ;;  %v699_v13 = vadd.f32 %v667_v17, %v619_v11  ;;  %v1745_v57 = vld [vmem:[#allocation47_spill] sm:$0xff] }
 0x11c   :  { %v368_v0 = vpop.permute.xlu1 %367  ;;  %v366_v60 = vpop.permute.xlu0 %365 }
 0x11d   :  { %732 = vst [vmem:[#allocation14 + $0x78] sm:$0xff] %v700_v58  ;;  %731 = vst [vmem:[#allocation14 + $0x70] sm:$0xff] %v699_v13  ;;  %v670_v45 = vmul.f32 %v1475_v30, %v368_v0  ;;  %v669_v9 = vmul.f32 %v1477_v38, %v366_v60  ;;  %v626_v30 = vmul.f32 %v1503_v20, %v1741_v26  ;;  %v1742_v38 = vld [vmem:[#allocation44_spill] sm:$0xff]  ;;  %v1747_v58 = vld [vmem:[#allocation49_spill] sm:$0xff] }
 0x11e   :  { %v625_v4 = vmul.f32 %v1505_v55, %v1742_v38 }
 0x11f   :  { %v702_v34 = vadd.f32 %v670_v45, %v622_v1  ;;  %v701_v24 = vadd.f32 %v669_v9, %v621_v19 }
 0x120   :  { %v372_v62 = vpop.permute.xlu1 %371  ;;  %v370_v29 = vpop.permute.xlu0 %369 }
 0x121   :  { %734 = vst [vmem:[#allocation14 + $0x88] sm:$0xff] %v702_v34  ;;  %733 = vst [vmem:[#allocation14 + $0x80] sm:$0xff] %v701_v24  ;;  %v672_v7 = vmul.f32 %v1489_v18, %v372_v62  ;;  %v671_v25 = vmul.f32 %v1491_v53, %v370_v29  ;;  %v628_v18 = vmul.f32 %v1517_v5, %v1743_v51  ;;  %v1744_v53 = vld [vmem:[#allocation46_spill] sm:$0xff]  ;;  %v1751_v62 = vld [vmem:[#allocation53_spill] sm:$0xff] }
 0x122   :  { %v627_v11 = vmul.f32 %v1519_v43, %v1744_v53 }
 0x123   :  { %v704_v59 = vadd.f32 %v672_v7, %v624_v52  ;;  %v703_v48 = vadd.f32 %v671_v25, %v623_v54 }
 0x124   :  { %v376_v27 = vpop.permute.xlu1 %375  ;;  %v374_v31 = vpop.permute.xlu0 %373 }
 0x125   :  { %736 = vst [vmem:[#allocation14 + $0x98] sm:$0xff] %v704_v59  ;;  %735 = vst [vmem:[#allocation14 + $0x90] sm:$0xff] %v703_v48  ;;  %v674_v8 = vmul.f32 %v1509_v3, %v376_v27  ;;  %v673_v15 = vmul.f32 %v1511_v50, %v374_v31  ;;  %v630_v3 = vmul.f32 %v1531_v2, %v1745_v57  ;;  %v1746_v50 = vld [vmem:[#allocation48_spill] sm:$0xff] }
 0x126   :  { %v629_v17 = vmul.f32 %v1533_v47, %v1746_v50 }
 0x127   :  { %v706_v20 = vadd.f32 %v674_v8, %v626_v30  ;;  %v705_v35 = vadd.f32 %v673_v15, %v625_v4 }
 0x128   :  { %v380_v10 = vpop.permute.xlu1 %379  ;;  %v378_v55 = vpop.permute.xlu0 %377 }
 0x129   :  { %738 = vst [vmem:[#allocation14 + $0xa8] sm:$0xff] %v706_v20  ;;  %737 = vst [vmem:[#allocation14 + $0xa0] sm:$0xff] %v705_v35  ;;  %v676_v44 = vmul.f32 %v1523_v42, %v380_v10  ;;  %v675_v32 = vmul.f32 %v1525_v41, %v378_v55  ;;  %v632_v42 = vmul.f32 %v1545_v16, %v1747_v58  ;;  %v1748_v41 = vld [vmem:[#allocation50_spill] sm:$0xff] }
 0x12a   :  { %v631_v13 = vmul.f32 %v1547_v56, %v1748_v41 }
 0x12b   :  { %v708_v5 = vadd.f32 %v676_v44, %v628_v18  ;;  %v707_v33 = vadd.f32 %v675_v32, %v627_v11 }
 0x12c   :  { %v384_v1 = vpop.permute.xlu1 %383  ;;  %v382_v43 = vpop.permute.xlu0 %381 }
 0x12d   :  { %740 = vst [vmem:[#allocation14 + $0xb8] sm:$0xff] %v708_v5  ;;  %739 = vst [vmem:[#allocation14 + $0xb0] sm:$0xff] %v707_v33  ;;  %v678_v63 = vmul.f32 %v1537_v28, %v384_v1  ;;  %v677_v19 = vmul.f32 %v1539_v49, %v382_v43  ;;  %v634_v28 = vmul.f32 %v1559_v36, %v1749_v22  ;;  %v1750_v49 = vld [vmem:[#allocation52_spill] sm:$0xff] }
 0x12e   :  { %v633_v52 = vmul.f32 %v1561_v21, %v1750_v49 }
 0x12f   :  { %v710_v2 = vadd.f32 %v678_v63, %v630_v3  ;;  %v709_v0 = vadd.f32 %v677_v19, %v629_v17 }
 0x130   :  { %v388_v60 = vpop.permute.xlu1 %387  ;;  %v386_v47 = vpop.permute.xlu0 %385 }
 0x131   :  { %742 = vst [vmem:[#allocation14 + $0xc8] sm:$0xff] %v710_v2  ;;  %741 = vst [vmem:[#allocation14 + $0xc0] sm:$0xff] %v709_v0  ;;  %v680_v45 = vmul.f32 %v1551_v12, %v388_v60  ;;  %v679_v9 = vmul.f32 %v1553_v61, %v386_v47  ;;  %v636_v12 = vmul.f32 %v1573_v39, %v1751_v62  ;;  %v1752_v61 = vld [vmem:[#allocation54_spill] sm:$0xff] }
 0x132   :  { %v635_v29 = vmul.f32 %v1575_v6, %v1752_v61 }
 0x133   :  { %v712_v16 = vadd.f32 %v680_v45, %v632_v42  ;;  %v711_v46 = vadd.f32 %v679_v9, %v631_v13 }
 0x134   :  { %v392_v54 = vpop.permute.xlu1 %391  ;;  %v390_v56 = vpop.permute.xlu0 %389 }
 0x135   :  { %744 = vst [vmem:[#allocation14 + $0xd8] sm:$0xff] %v712_v16  ;;  %743 = vst [vmem:[#allocation14 + $0xd0] sm:$0xff] %v711_v46  ;;  %v682_v34 = vmul.f32 %v1565_v40, %v392_v54  ;;  %v681_v24 = vmul.f32 %v1567_v23, %v390_v56 }
 0x137   :  { %v714_v36 = vadd.f32 %v682_v34, %v634_v28  ;;  %v713_v7 = vadd.f32 %v681_v24, %v633_v52 }
 0x138   :  { %v396_v25 = vpop.permute.xlu1 %395  ;;  %v394_v21 = vpop.permute.xlu0 %393 }
 0x139   :  { %746 = vst [vmem:[#allocation14 + $0xe8] sm:$0xff] %v714_v36  ;;  %745 = vst [vmem:[#allocation14 + $0xe0] sm:$0xff] %v713_v7  ;;  %v684_v26 = vmul.f32 %v1579_v37, %v396_v25  ;;  %v683_v40 = vmul.f32 %v1581_v14, %v394_v21 }
 0x13b   :  { %v716_v30 = vadd.f32 %v684_v26, %v636_v12  ;;  %v715_v23 = vadd.f32 %v683_v40, %v635_v29 }
 0x13d   :  { %748 = vst [vmem:[#allocation14 + $0xf8] sm:$0xff] %v716_v30  ;;  %747 = vst [vmem:[#allocation14 + $0xf0] sm:$0xff] %v715_v23 }
 0x13e   :  { %947 = shalt.err (!%p944_p11)
}
 0x13f   :  { %772 = dma.vmem_to_hbm [thread:$0]  %s767_s12, 4096, %s1650_s7, [#allocation15], %s970_s29, %s970_s29, %s971_s30  }
 0x140   :  { %964 = dma.done.wait [#allocation4], 4096  }
 0x141   :  { %965 = vsyncadd [#allocation4], 4294963200 }
 0x142   :  { %966 = dma.done.wait [#allocation15], 4096  }
 0x143   :  { %967 = vsyncadd [#allocation15], 4294963200 }
 0x144   :  { %779 = vsyncpa [#allocation3], 1 }
 0x145   :  { %780 = vsyncpa [#allocation6], 1 }
 0x146   :  { %781 = vsyncpa [#allocation9], 1 }
 0x147   :  { %782 = vsyncpa [#allocation12], 1 }
 0x148   :  { %783 = vsyncpa [#allocation4], 1 }
 0x149   :  { %784 = vsyncpa [#allocation15], 1 }

</bundles_post_ra>
